<compile_context>
chip_gen: v5e
topology: v5e:2x2
jax: 0.10.0
libtpu: 0.0.40
codegen_flags: <defaults>
</compile_context>

<pallas_src>
import functools

import jax
import jax.numpy as jnp
from jax import lax
from jax.experimental import pallas as pl
from jax.experimental.pallas import tpu as pltpu


def _pick_batch_block(n):
    """Largest divisor of n (capped at 8) that still leaves >= 2 grid steps."""
    best = 1
    for d in range(1, n // 2 + 1):
        if n % d == 0 and d <= 8:
            best = d
    return best


@functools.partial(jax.jit, static_argnames=("kernel", "stride"))
def upsample_pallas(x_nchw, weight, bias, *, kernel, stride):
    """ConvTranspose2d forward.

    x_nchw : (N, Cin, H, W)        -- PyTorch layout
    weight : (Cin, Cout, K, K)     -- PyTorch ConvTranspose2d weight layout
    bias   : (Cout,)
    returns: (N, Cout, H_out, W_out)
    """
    N, Cin, H, W = x_nchw.shape
    Cout = weight.shape[1]
    K, S = kernel, stride

    T = -(-K // S)                      # taps per output phase = ceil(K / S)
    Kp = T * S                          # zero-padded kernel extent (== K when K % S == 0)
    Hq, Wq = H + T - 1, W + T - 1       # per-phase output extent
    Ho, Wo = (H - 1) * S + K, (W - 1) * S + K
    WqC = Wq * Cout                     # lane-merged minor dim of the per-phase output
    WCin = W * Cin                      # GEMM contraction dim
    NCOL = T * WqC                      # GEMM output columns per phase

    Bt = _pick_batch_block(N)

    # ---------------- wrapper-side packing (tiny arrays, plain XLA) ---------------------
    # Input NCHW -> (N, H, W*Cin) so the GEMM contracts over (j, ci).
    x_l = jnp.transpose(x_nchw, (0, 2, 3, 1)).reshape(N, H, WCin)

    # Per-phase block-sparse packed weight:
    #   WP[p, j*Cin+ci, (th*Wq + qw)*Cout + co] = w[ci, co, th*S+ph, (qw-j)*S+pw]
    #                                              if 0 <= qw-j < T else 0,   p = ph*S+pw
    # so row i of the phase-p GEMM output already holds, per tap row th, the fully
    # W-overlap-added slab in lane-dense (qw*Cout + co) order.
    wpad = jnp.pad(weight, ((0, 0), (0, 0), (0, Kp - K), (0, Kp - K)))      # (Cin,Cout,Kp,Kp)
    w6 = wpad.reshape(Cin, Cout, T, S, T, S)                                # kh=th*S+ph, kw=tw*S+pw
    wph = jnp.transpose(w6, (3, 5, 2, 4, 1, 0)).reshape(S * S, T, T, Cout, Cin)
    tw_idx = jnp.arange(Wq)[None, :] - jnp.arange(W)[:, None]               # (W, Wq): qw - j
    valid = (tw_idx >= 0) & (tw_idx < T)
    wg = wph[:, :, jnp.clip(tw_idx, 0, T - 1), :, :]                        # (S*S,T,W,Wq,Cout,Cin)
    wg = wg * valid[None, None, :, :, None, None].astype(wph.dtype)
    wp = jnp.transpose(wg, (0, 2, 5, 1, 3, 4)).reshape(S * S, WCin, NCOL)   # (S*S, W*Cin, T*Wq*Cout)

    b2 = jnp.tile(bias, Wq).reshape(1, WqC)        # bias in merged (qw*Cout + co) lane order

    def _row_place(slab, th):
        """(H, WqC) -> (Hq, WqC) with `slab` at rows [th, th+H), zeros elsewhere."""
        parts = []
        if th > 0:
            parts.append(jnp.zeros((th, WqC), slab.dtype))
        parts.append(slab)
        if (T - 1) - th > 0:
            parts.append(jnp.zeros((T - 1 - th, WqC), slab.dtype))
        return parts[0] if len(parts) == 1 else jnp.concatenate(parts, axis=0)

    def convt_kernel(x_ref, w_ref, b_ref, o_ref):
        # x_ref: (Bt, H, W*Cin)   w_ref: (S*S, W*Cin, T*Wq*Cout)   b_ref: (1, Wq*Cout)
        # o_ref: (Bt, S, S, Hq, Wq*Cout)
        xb = x_ref[...].reshape(Bt * H, WCin)                  # leading-dim merge (layout-free)
        bias_tile = jnp.broadcast_to(b_ref[...], (Hq, WqC))    # hoisted: one broadcast per step
        for p in range(S * S):
            ph, pw = p // S, p % S
            # One MXU GEMM per phase over the whole batch block; the result is already
            # lane-dense and W-overlap-added -- no transpose, no reshape, no lane shuffles.
            y = jnp.dot(xb, w_ref[p], preferred_element_type=jnp.float32)   # (Bt*H, T*WqC)
            for b in range(Bt):
                acc = bias_tile                                 # register accumulator
                for th in range(T):
                    slab = y[b * H:(b + 1) * H, th * WqC:(th + 1) * WqC]    # (H, WqC)
                    acc = acc + _row_place(slab, th)            # sublane-shifted wide VPU adds
                o_ref[b, ph, pw] = acc.astype(o_ref.dtype)      # ONE wide store per phase

    out_ph = pl.pallas_call(
        convt_kernel,
        out_shape=jax.ShapeDtypeStruct((N, S, S, Hq, WqC), x_nchw.dtype),
        grid_spec=pltpu.PrefetchScalarGridSpec(
            num_scalar_prefetch=0,
            grid=(N // Bt,),
            in_specs=[
                pl.BlockSpec((Bt, H, WCin), lambda n: (n, 0, 0)),
                pl.BlockSpec((S * S, WCin, NCOL), lambda n: (0, 0, 0)),
                pl.BlockSpec((1, WqC), lambda n: (0, 0)),
            ],
            out_specs=pl.BlockSpec((Bt, S, S, Hq, WqC), lambda n: (n, 0, 0, 0, 0)),
        ),
        compiler_params=pltpu.CompilerParams(
            dimension_semantics=("parallel",),
        ),
    )(x_l, wp, b2)

    # Interleave phases and return to NCHW in ONE fused XLA transpose:
    #   out[n, co, qh*S + ph, qw*S + pw] = out_ph[n, ph, pw, qh, qw*Cout + co]
    o = out_ph.reshape(N, S, S, Hq, Wq, Cout)
    o = jnp.transpose(o, (0, 5, 3, 1, 4, 2)).reshape(N, Cout, S * Hq, S * Wq)
    return o[:, :, :Ho, :Wo]


def _reference(x_nchw, weight, bias, *, kernel, stride):
    """Pure-JAX reference for ConvTranspose2d (correctness check only)."""
    K, s = kernel, stride
    x_nhwc = jnp.transpose(x_nchw, (0, 2, 3, 1))
    wf = jnp.transpose(weight, (2, 3, 0, 1))[::-1, ::-1]       # (K, K, Cin, Cout) HWIO
    out = lax.conv_general_dilated(
        x_nhwc, wf,
        window_strides=(1, 1),
        padding=[(K - 1, K - 1), (K - 1, K - 1)],
        lhs_dilation=(s, s),
        dimension_numbers=("NHWC", "HWIO", "NHWC"),
    ) + bias.reshape(1, 1, 1, -1)
    return jnp.transpose(out, (0, 3, 1, 2))


if __name__ == "__main__":
    def run_case(N, Cin, Cout, H, W, K, S):
        key = jax.random.PRNGKey(0)
        kx, kw, kb = jax.random.split(key, 3)
        x = jax.random.normal(kx, (N, Cin, H, W), dtype=jnp.float32)
        weight = 0.1 * jax.random.normal(kw, (Cin, Cout, K, K), dtype=jnp.float32)
        bias = 0.1 * jax.random.normal(kb, (Cout,), dtype=jnp.float32)

        out = jax.block_until_ready(upsample_pallas(x, weight, bias, kernel=K, stride=S))
        ref = _reference(x, weight, bias, kernel=K, stride=S)

        assert out.shape == (N, Cout, (H - 1) * S + K, (W - 1) * S + K), out.shape
        err = float(jnp.max(jnp.abs(out - ref)))
        assert jnp.allclose(out, ref, rtol=1e-4, atol=1e-4), err

    # Upsample(input_dim=4, output_dim=8, kernel=4, stride=2) on a (2, 4, 16, 16) input.
    run_case(N=2, Cin=4, Cout=8, H=16, W=16, K=4, S=2)
    # K % stride != 0 path (padded taps + trimmed output tail).
    run_case(N=2, Cin=4, Cout=8, H=16, W=16, K=3, S=2)
    # Batch-fold path (Bt = 2 images per grid step, grid keeps 2 parallel steps).
    run_case(N=4, Cin=4, Cout=8, H=16, W=16, K=4, S=2)

    print("KERNEL_OK")
</pallas_src>

<mosaic_0001>
module attributes {stable_mosaic.version = 11 : i64} {
  func.func @convt_kernel(%arg0: i32, %arg1: memref<1x16x64xf32, #tpu.memory_space<vmem>>, %arg2: memref<4x64x272xf32, #tpu.memory_space<vmem>>, %arg3: memref<1x136xf32, #tpu.memory_space<vmem>>, %arg4: memref<1x2x2x17x136xf32, #tpu.memory_space<vmem>>) attributes {dimension_semantics = [#tpu.dimension_semantics<parallel>], iteration_bounds = array<i64: 2>, scalar_prefetch = 0 : i64, scratch_operands = 0 : i64, tpu.core_type = #tpu.core_type<tc>, window_params = [{transform_indices = @transform_0, window_bounds = array<i64: 1, 16, 64>}, {pipeline_mode = #tpu.pipeline_mode<synchronous>, transform_indices = @transform_1, window_bounds = array<i64: 4, 64, 272>}, {pipeline_mode = #tpu.pipeline_mode<synchronous>, transform_indices = @transform_2, window_bounds = array<i64: 1, 136>}, {transform_indices = @transform_3, window_bounds = array<i64: 1, 2, 2, 17, 136>}]} {
    %c0 = arith.constant 0 : index
    %c0_0 = arith.constant 0 : index
    %c0_1 = arith.constant 0 : index
    %0 = vector.load %arg1[%c0, %c0_0, %c0_1] : memref<1x16x64xf32, #tpu.memory_space<vmem>>, vector<1x16x64xf32>
    %1 = vector.shape_cast %0 : vector<1x16x64xf32> to vector<16x64xf32>
    %c0_2 = arith.constant 0 : index
    %c0_3 = arith.constant 0 : index
    %2 = vector.load %arg3[%c0_2, %c0_3] : memref<1x136xf32, #tpu.memory_space<vmem>>, vector<1x136xf32>
    %3 = vector.shape_cast %2 : vector<1x136xf32> to vector<1x136xf32>
    %4 = vector.broadcast %3 : vector<1x136xf32> to vector<17x136xf32>
    %c0_4 = arith.constant 0 : index
    %c0_5 = arith.constant 0 : index
    %c0_6 = arith.constant 0 : index
    %5 = vector.load %arg2[%c0_4, %c0_5, %c0_6] : memref<4x64x272xf32, #tpu.memory_space<vmem>>, vector<1x64x272xf32>
    %6 = vector.shape_cast %5 : vector<1x64x272xf32> to vector<64x272xf32>
    %cst = arith.constant dense<0.000000e+00> : vector<16x272xf32>
    %7 = tpu.matmul %1, %6, %cst {dimension_numbers = #tpu.dot_dimension_numbers<[1], [0], [0], [1], [0, 0, 1, 1], [], []>} : vector<16x64xf32>, vector<64x272xf32>, vector<16x272xf32> -> vector<16x272xf32>
    %8 = vector.extract_strided_slice %7 {offsets = [0, 0], sizes = [16, 136], strides = [1, 1]} : vector<16x272xf32> to vector<16x136xf32>
    %cst_7 = arith.constant 0.000000e+00 : f32
    %9 = vector.broadcast %cst_7 : f32 to vector<1x136xf32>
    %10 = tpu.concatenate %8, %9 in 0 : vector<16x136xf32>, vector<1x136xf32> -> vector<17x136xf32>
    %11 = arith.addf %4, %10 : vector<17x136xf32>
    %12 = vector.extract_strided_slice %7 {offsets = [0, 136], sizes = [16, 136], strides = [1, 1]} : vector<16x272xf32> to vector<16x136xf32>
    %cst_8 = arith.constant 0.000000e+00 : f32
    %13 = vector.broadcast %cst_8 : f32 to vector<1x136xf32>
    %14 = tpu.concatenate %13, %12 in 0 : vector<1x136xf32>, vector<16x136xf32> -> vector<17x136xf32>
    %15 = arith.addf %11, %14 : vector<17x136xf32>
    %c0_9 = arith.constant 0 : index
    %c0_10 = arith.constant 0 : index
    %c0_11 = arith.constant 0 : index
    %c0_12 = arith.constant 0 : index
    %c0_13 = arith.constant 0 : index
    %16 = vector.load %arg4[%c0_9, %c0_10, %c0_11, %c0_12, %c0_13] : memref<1x2x2x17x136xf32, #tpu.memory_space<vmem>>, vector<1x1x1x17x136xf32>
    %17 = vector.shape_cast %16 : vector<1x1x1x17x136xf32> to vector<17x136xf32>
    %18 = vector.shape_cast %15 : vector<17x136xf32> to vector<1x1x1x17x136xf32>
    tpu.vector_store %arg4[%c0_9, %c0_10, %c0_11, %c0_12, %c0_13], %18 {strides = array<i32>} : memref<1x2x2x17x136xf32, #tpu.memory_space<vmem>>, vector<1x1x1x17x136xf32>,
    %c1 = arith.constant 1 : index
    %c0_14 = arith.constant 0 : index
    %c0_15 = arith.constant 0 : index
    %19 = vector.load %arg2[%c1, %c0_14, %c0_15] : memref<4x64x272xf32, #tpu.memory_space<vmem>>, vector<1x64x272xf32>
    %20 = vector.shape_cast %19 : vector<1x64x272xf32> to vector<64x272xf32>
    %cst_16 = arith.constant dense<0.000000e+00> : vector<16x272xf32>
    %21 = tpu.matmul %1, %20, %cst_16 {dimension_numbers = #tpu.dot_dimension_numbers<[1], [0], [0], [1], [0, 0, 1, 1], [], []>} : vector<16x64xf32>, vector<64x272xf32>, vector<16x272xf32> -> vector<16x272xf32>
    %22 = vector.extract_strided_slice %21 {offsets = [0, 0], sizes = [16, 136], strides = [1, 1]} : vector<16x272xf32> to vector<16x136xf32>
    %cst_17 = arith.constant 0.000000e+00 : f32
    %23 = vector.broadcast %cst_17 : f32 to vector<1x136xf32>
    %24 = tpu.concatenate %22, %23 in 0 : vector<16x136xf32>, vector<1x136xf32> -> vector<17x136xf32>
    %25 = arith.addf %4, %24 : vector<17x136xf32>
    %26 = vector.extract_strided_slice %21 {offsets = [0, 136], sizes = [16, 136], strides = [1, 1]} : vector<16x272xf32> to vector<16x136xf32>
    %cst_18 = arith.constant 0.000000e+00 : f32
    %27 = vector.broadcast %cst_18 : f32 to vector<1x136xf32>
    %28 = tpu.concatenate %27, %26 in 0 : vector<1x136xf32>, vector<16x136xf32> -> vector<17x136xf32>
    %29 = arith.addf %25, %28 : vector<17x136xf32>
    %c0_19 = arith.constant 0 : index
    %c0_20 = arith.constant 0 : index
    %c1_21 = arith.constant 1 : index
    %c0_22 = arith.constant 0 : index
    %c0_23 = arith.constant 0 : index
    %30 = vector.load %arg4[%c0_19, %c0_20, %c1_21, %c0_22, %c0_23] : memref<1x2x2x17x136xf32, #tpu.memory_space<vmem>>, vector<1x1x1x17x136xf32>
    %31 = vector.shape_cast %30 : vector<1x1x1x17x136xf32> to vector<17x136xf32>
    %32 = vector.shape_cast %29 : vector<17x136xf32> to vector<1x1x1x17x136xf32>
    tpu.vector_store %arg4[%c0_19, %c0_20, %c1_21, %c0_22, %c0_23], %32 {strides = array<i32>} : memref<1x2x2x17x136xf32, #tpu.memory_space<vmem>>, vector<1x1x1x17x136xf32>,
    %c2 = arith.constant 2 : index
    %c0_24 = arith.constant 0 : index
    %c0_25 = arith.constant 0 : index
    %33 = vector.load %arg2[%c2, %c0_24, %c0_25] : memref<4x64x272xf32, #tpu.memory_space<vmem>>, vector<1x64x272xf32>
    %34 = vector.shape_cast %33 : vector<1x64x272xf32> to vector<64x272xf32>
    %cst_26 = arith.constant dense<0.000000e+00> : vector<16x272xf32>
    %35 = tpu.matmul %1, %34, %cst_26 {dimension_numbers = #tpu.dot_dimension_numbers<[1], [0], [0], [1], [0, 0, 1, 1], [], []>} : vector<16x64xf32>, vector<64x272xf32>, vector<16x272xf32> -> vector<16x272xf32>
    %36 = vector.extract_strided_slice %35 {offsets = [0, 0], sizes = [16, 136], strides = [1, 1]} : vector<16x272xf32> to vector<16x136xf32>
    %cst_27 = arith.constant 0.000000e+00 : f32
    %37 = vector.broadcast %cst_27 : f32 to vector<1x136xf32>
    %38 = tpu.concatenate %36, %37 in 0 : vector<16x136xf32>, vector<1x136xf32> -> vector<17x136xf32>
    %39 = arith.addf %4, %38 : vector<17x136xf32>
    %40 = vector.extract_strided_slice %35 {offsets = [0, 136], sizes = [16, 136], strides = [1, 1]} : vector<16x272xf32> to vector<16x136xf32>
    %cst_28 = arith.constant 0.000000e+00 : f32
    %41 = vector.broadcast %cst_28 : f32 to vector<1x136xf32>
    %42 = tpu.concatenate %41, %40 in 0 : vector<1x136xf32>, vector<16x136xf32> -> vector<17x136xf32>
    %43 = arith.addf %39, %42 : vector<17x136xf32>
    %c0_29 = arith.constant 0 : index
    %c1_30 = arith.constant 1 : index
    %c0_31 = arith.constant 0 : index
    %c0_32 = arith.constant 0 : index
    %c0_33 = arith.constant 0 : index
    %44 = vector.load %arg4[%c0_29, %c1_30, %c0_31, %c0_32, %c0_33] : memref<1x2x2x17x136xf32, #tpu.memory_space<vmem>>, vector<1x1x1x17x136xf32>
    %45 = vector.shape_cast %44 : vector<1x1x1x17x136xf32> to vector<17x136xf32>
    %46 = vector.shape_cast %43 : vector<17x136xf32> to vector<1x1x1x17x136xf32>
    tpu.vector_store %arg4[%c0_29, %c1_30, %c0_31, %c0_32, %c0_33], %46 {strides = array<i32>} : memref<1x2x2x17x136xf32, #tpu.memory_space<vmem>>, vector<1x1x1x17x136xf32>,
    %c3 = arith.constant 3 : index
    %c0_34 = arith.constant 0 : index
    %c0_35 = arith.constant 0 : index
    %47 = vector.load %arg2[%c3, %c0_34, %c0_35] : memref<4x64x272xf32, #tpu.memory_space<vmem>>, vector<1x64x272xf32>
    %48 = vector.shape_cast %47 : vector<1x64x272xf32> to vector<64x272xf32>
    %cst_36 = arith.constant dense<0.000000e+00> : vector<16x272xf32>
    %49 = tpu.matmul %1, %48, %cst_36 {dimension_numbers = #tpu.dot_dimension_numbers<[1], [0], [0], [1], [0, 0, 1, 1], [], []>} : vector<16x64xf32>, vector<64x272xf32>, vector<16x272xf32> -> vector<16x272xf32>
    %50 = vector.extract_strided_slice %49 {offsets = [0, 0], sizes = [16, 136], strides = [1, 1]} : vector<16x272xf32> to vector<16x136xf32>
    %cst_37 = arith.constant 0.000000e+00 : f32
    %51 = vector.broadcast %cst_37 : f32 to vector<1x136xf32>
    %52 = tpu.concatenate %50, %51 in 0 : vector<16x136xf32>, vector<1x136xf32> -> vector<17x136xf32>
    %53 = arith.addf %4, %52 : vector<17x136xf32>
    %54 = vector.extract_strided_slice %49 {offsets = [0, 136], sizes = [16, 136], strides = [1, 1]} : vector<16x272xf32> to vector<16x136xf32>
    %cst_38 = arith.constant 0.000000e+00 : f32
    %55 = vector.broadcast %cst_38 : f32 to vector<1x136xf32>
    %56 = tpu.concatenate %55, %54 in 0 : vector<1x136xf32>, vector<16x136xf32> -> vector<17x136xf32>
    %57 = arith.addf %53, %56 : vector<17x136xf32>
    %c0_39 = arith.constant 0 : index
    %c1_40 = arith.constant 1 : index
    %c1_41 = arith.constant 1 : index
    %c0_42 = arith.constant 0 : index
    %c0_43 = arith.constant 0 : index
    %58 = vector.load %arg4[%c0_39, %c1_40, %c1_41, %c0_42, %c0_43] : memref<1x2x2x17x136xf32, #tpu.memory_space<vmem>>, vector<1x1x1x17x136xf32>
    %59 = vector.shape_cast %58 : vector<1x1x1x17x136xf32> to vector<17x136xf32>
    %60 = vector.shape_cast %57 : vector<17x136xf32> to vector<1x1x1x17x136xf32>
    tpu.vector_store %arg4[%c0_39, %c1_40, %c1_41, %c0_42, %c0_43], %60 {strides = array<i32>} : memref<1x2x2x17x136xf32, #tpu.memory_space<vmem>>, vector<1x1x1x17x136xf32>,
    return
  }
  func.func @transform_0(%arg0: i32) -> (i32, i32, i32) {
    %c0_i32 = arith.constant 0 : i32
    %c0_i32_0 = arith.constant 0 : i32
    %c0_i32_1 = arith.constant 0 : i32
    return %arg0, %c0_i32, %c0_i32_0 : i32, i32, i32
  }
  func.func @transform_1(%arg0: i32) -> (i32, i32, i32) {
    %c0_i32 = arith.constant 0 : i32
    %c0_i32_0 = arith.constant 0 : i32
    %c0_i32_1 = arith.constant 0 : i32
    %c0_i32_2 = arith.constant 0 : i32
    return %c0_i32, %c0_i32_0, %c0_i32_1 : i32, i32, i32
  }
  func.func @transform_2(%arg0: i32) -> (i32, i32) {
    %c0_i32 = arith.constant 0 : i32
    %c0_i32_0 = arith.constant 0 : i32
    %c0_i32_1 = arith.constant 0 : i32
    return %c0_i32, %c0_i32_0 : i32, i32
  }
  func.func @transform_3(%arg0: i32) -> (i32, i32, i32, i32, i32) {
    %c0_i32 = arith.constant 0 : i32
    %c0_i32_0 = arith.constant 0 : i32
    %c0_i32_1 = arith.constant 0 : i32
    %c0_i32_2 = arith.constant 0 : i32
    %c0_i32_3 = arith.constant 0 : i32
    return %arg0, %c0_i32, %c0_i32_0, %c0_i32_1, %c0_i32_2 : i32, i32, i32, i32, i32
  }
}

</mosaic_0001>

<bundles_post_ra>
// kernel: tile.8
= control target key start
LH: loop header
LB: loop body
LE: loop exit
PB: predicated region body
PF: predicated region fallthrough
CT: control target
= control target key end

     0   :  { %s34_s0 = inlined_call_operand.vmem [shape: f32[8], index: 0, kind: input, shape index: {}]   ;;  %s35_s1 = inlined_call_operand.vmem [shape: f32[17,8], index: 1, kind: output, shape index: {}]  }
   0x1   :  { %v4_v0 = vld [vmem:[%s34_s0] ss:$0 sm:$0xff] }
   0x2   :  { %5 = vst [vmem:[%s35_s1] sm:$0xff] %v4_v0 }
   0x3   :  { %10 = vst [vmem:[%s35_s1 + $0x8] sm:$0xff] %v4_v0 }
   0x4   :  { %11 = vst [vmem:[%s35_s1 + $0x10] sm:$0xff] %v4_v0 }

// kernel: tile.9
= control target key start
LH: loop header
LB: loop body
LE: loop exit
PB: predicated region body
PF: predicated region fallthrough
CT: control target
= control target key end

     0   :  { %s139_s10 = smov 120   ;;  %s140_s11 = smov 104   ;;  %vm4_vm0 = vcmask 64512   ;;  %vm10_vm1 = vcmask 1048512   ;;  %vm16_vm2 = vcmask 982912   ;;  %vm22_vm3 = vcmask 917312   ;;  %s218_s0 = inlined_call_operand.vmem [shape: f32[17,8], index: 0, kind: input, shape index: {}]   ;;  %s219_s1 = inlined_call_operand.vmem [shape: f32[1,136], index: 1, kind: output, shape index: {}]  }
   0x1   :  { %v108_v0 = vld [vmem:[%s218_s0 + $0xf] sm:$0x1]   ;;  %v110_v1 = vld [vmem:[%s218_s0 + $0xd] sm:$0x1]   ;;  %v112_v2 = vld [vmem:[%s218_s0 + $0xb] sm:$0x1]  }
   0x2   :  { %8 = vrot.lane.b32.xlu0 %v108_v0, %s139_s10  ;;  %20 = vrot.lane.b32.xlu1 %v110_v1, %s140_s11  ;;  %s141_s14 = smov 88   ;;  %v109_v3 = vld [vmem:[%s218_s0 + $0xe] sm:$0x1]   ;;  %v111_v4 = vld [vmem:[%s218_s0 + $0xc] sm:$0x1]   ;;  %s142_s19 = smov 112  }
   0x3   :  { %32 = vrot.lane.b32.xlu2 %v112_v2, %s141_s14  ;;  %s143_s20 = smov 96   ;;  %v113_v5 = vld [vmem:[%s218_s0 + $0xa] sm:$0x1]   ;;  %s144_s23 = smov 80   ;;  %v114_v6 = vld [vmem:[%s218_s0 + $0x9] sm:$0x1]  }
   0x4   :  { %v115_v7 = vld [vmem:[%s218_s0 + $0x8] sm:$0x1]   ;;  %s145_s28 = smov 72   ;;  %s146_s29 = smov 64   ;;  %v116_v8 = vld [vmem:[%s218_s0 + $0x7] sm:$0x1]  }
   0x5   :  { %s147_s3 = smov 56   ;;  %v117_v9 = vld [vmem:[%s218_s0 + $0x6] sm:$0x1]   ;;  %v118_v10 = vld [vmem:[%s218_s0 + $0x5] sm:$0x1]   ;;  %s148_s8 = smov 48  }
   0x6   :  { %s149_s9 = smov 40   ;;  %v119_v11 = vld [vmem:[%s218_s0 + $0x4] sm:$0x1]   ;;  %s150_s12 = smov 32   ;;  %v120_v12 = vld [vmem:[%s218_s0 + $0x3] sm:$0x1]  }
   0x7   :  { %v121_v13 = vld [vmem:[%s218_s0 + $0x2] sm:$0x1]   ;;  %s151_s17 = smov 24   ;;  %s152_s18 = smov 16   ;;  %v122_v14 = vld [vmem:[%s218_s0 + $0x1] sm:$0x1]  }
   0x8   :  { %s153_s21 = smov 8   ;;  %s2_s22 = smov 3  ;;  %vm28_vm4 = vcmask 851712   ;;  %vm34_vm5 = vcmask 786112   ;;  %vm40_vm6 = vcmask 720512   ;;  %vm46_vm7 = vcmask 654912  }
   0x9   :  { %v3_v15 = vld [vmem:[%s218_s0] ss:$16 sm:%s2_s22]   ;;  %vm52_vm8 = vcmask 589312   ;;  %vm58_vm9 = vcmask 523712   ;;  %vm64_vm10 = vcmask 458112   ;;  %vm70_vm11 = vcmask 392512  }
   0xa   :  { %14 = vrot.lane.b32.xlu0 %v109_v3, %s142_s19  ;;  %26 = vrot.lane.b32.xlu1 %v111_v4, %s143_s20  ;;  %5 = vst.msk [vmem:[#allocation0] ss:$8 sm:$0x3] %vm4_vm0, %v3_v15   ;;  %vm76_vm12 = vcmask 326912   ;;  %vm82_vm13 = vcmask 261312   ;;  %vm88_vm14 = vcmask 195712  }
   0xb   :  { %38 = vrot.lane.b32.xlu2 %v113_v5, %s144_s23  ;;  %vm94_vm15 = vcmask 130112  }
  0x11   :  { %v103_v16 = vld [vmem:[#allocation0 + $0x8] sm:$0x1] }
  0x12   :  { %44 = vrot.lane.b32.xlu0 %v114_v6, %s145_s28  ;;  %50 = vrot.lane.b32.xlu1 %v115_v7, %s146_s29  ;;  %123 = vst [vmem:[%s219_s1 + $0x1] sm:$0x1] %v103_v16 }
  0x13   :  { %56 = vrot.lane.b32.xlu2 %v116_v8, %s147_s3 }
  0x1a   :  { %62 = vrot.lane.b32.xlu0 %v117_v9, %s148_s8  ;;  %68 = vrot.lane.b32.xlu1 %v118_v10, %s149_s9 }
  0x1b   :  { %74 = vrot.lane.b32.xlu2 %v119_v11, %s150_s12 }
  0x22   :  { %80 = vrot.lane.b32.xlu0 %v120_v12, %s151_s17  ;;  %86 = vrot.lane.b32.xlu1 %v121_v13, %s152_s18 }
  0x23   :  { %92 = vrot.lane.b32.xlu2 %v122_v14, %s153_s21 }
  0x5d   :  { %v33_v17 = vpop.permute.xlu2 %32  }
  0x65   :  { %v39_v18 = vpop.permute.xlu2 %38  }
  0x6d   :  { %v57_v19 = vpop.permute.xlu2 %56  }
  0x74   :  { %v9_v20 = vpop.permute.xlu0 %8   ;;  %v21_v21 = vpop.permute.xlu1 %20  }
  0x75   :  { %11 = vst.msk [vmem:[#allocation0] sm:$0x1] %vm10_vm1, %v9_v20   ;;  %v75_v22 = vpop.permute.xlu2 %74  }
  0x7c   :  { %v15_v23 = vpop.permute.xlu0 %14   ;;  %v27_v24 = vpop.permute.xlu1 %26  }
  0x7d   :  { %17 = vst.msk [vmem:[#allocation0] sm:$0x1] %vm16_vm2, %v15_v23   ;;  %v93_v25 = vpop.permute.xlu2 %92  }
  0x7e   :  { %23 = vst.msk [vmem:[#allocation0] sm:$0x1] %vm22_vm3, %v21_v21  }
  0x7f   :  { %29 = vst.msk [vmem:[#allocation0] sm:$0x1] %vm28_vm4, %v27_v24  }
  0x80   :  { %35 = vst.msk [vmem:[#allocation0] sm:$0x1] %vm34_vm5, %v33_v17  }
  0x81   :  { %41 = vst.msk [vmem:[#allocation0] sm:$0x1] %vm40_vm6, %v39_v18  }
  0x84   :  { %v45_v26 = vpop.permute.xlu0 %44   ;;  %v51_v27 = vpop.permute.xlu1 %50  }
  0x85   :  { %47 = vst.msk [vmem:[#allocation0] sm:$0x1] %vm46_vm7, %v45_v26  }
  0x86   :  { %53 = vst.msk [vmem:[#allocation0] sm:$0x1] %vm52_vm8, %v51_v27  }
  0x87   :  { %59 = vst.msk [vmem:[#allocation0] sm:$0x1] %vm58_vm9, %v57_v19  }
  0x8c   :  { %v63_v28 = vpop.permute.xlu0 %62   ;;  %v69_v29 = vpop.permute.xlu1 %68  }
  0x8d   :  { %65 = vst.msk [vmem:[#allocation0] sm:$0x1] %vm64_vm10, %v63_v28  }
  0x8e   :  { %71 = vst.msk [vmem:[#allocation0] sm:$0x1] %vm70_vm11, %v69_v29  }
  0x8f   :  { %77 = vst.msk [vmem:[#allocation0] sm:$0x1] %vm76_vm12, %v75_v22  }
  0x94   :  { %v81_v30 = vpop.permute.xlu0 %80   ;;  %v87_v31 = vpop.permute.xlu1 %86  }
  0x95   :  { %83 = vst.msk [vmem:[#allocation0] sm:$0x1] %vm82_vm13, %v81_v30  }
  0x96   :  { %89 = vst.msk [vmem:[#allocation0] sm:$0x1] %vm88_vm14, %v87_v31  }
  0x97   :  { %95 = vst.msk [vmem:[#allocation0] sm:$0x1] %vm94_vm15, %v93_v25  }
  0x9e   :  { %v98_v32 = vld [vmem:[#allocation0] sm:$0x1] }
  0x9f   :  { %101 = vst [vmem:[%s219_s1] sm:$0x1] %v98_v32 }

// kernel: upsample_pallas.1
= control target key start
LH: loop header
LB: loop body
LE: loop exit
PB: predicated region body
PF: predicated region fallthrough
CT: control target
= control target key end

     0   :  { %s985_s12 = smov 0   ;;  %s1527_s0 = inlined_call_operand.vmem [shape: f32[2,16,64], index: 0, kind: input, shape index: {}]   ;;  %s1528_s1 = inlined_call_operand.vmem [shape: f32[4,64,272], index: 1, kind: input, shape index: {}]   ;;  %s1529_s2 = inlined_call_operand.vmem [shape: f32[1,136], index: 2, kind: input, shape index: {}]   ;;  %s1530_s3 = inlined_call_operand.vmem [shape: f32[2,2,2,17,136], index: 3, kind: output, shape index: {}]  }
   0x1 LB: > { %s821_s13 = sadd.s32 4294967295, %s962_s12   ;;  %p825_p0 = scmp.ge.s32.totalorder %s962_s12, 1  ;;  %s962_s12 = sphi %s985_s12, %s13_s12  }
   0x2   : > { %p137_p1 = scmp.lt.s32.totalorder %s962_s12, 3 }
   0x4   : > { %p138_p2 = pnand %p825_p0, %p137_p1 }
   0x5   : > { %p1002_p3 = scmp.lt.s32.totalorder (!%p138_p2), %s821_s13, 1  ;;  %s964_s29 = smov (!%p138_p2), 120  }
   0x6   : > { %141 = sbr.rel (%p138_p2) target bundleno = 343 (0x157), region = 32 }
   0xb   : > { %v200_v0 = vld [vmem:[%s1528_s1 + $0xa8] sm:$0xff]  ;;  %v201_v1 = vld [vmem:[%s1528_s1 + $0xb0] sm:$0xff]  ;;  %v202_v2 = vld [vmem:[%s1528_s1 + $0xb8] sm:$0xff]  ;;  %s1533_s13 = smov (!%p1002_p3, %s821_s13), 1  ;;  %vm203_vm0 = vcmask 523264   ;;  %vm289_vm1 = vcmask 1040384  }
   0xc   : > { %218 = vmatpush.msra.mxu0 %v200_v0  ;;  %241 = vmatpush.msra.mxu1 %v201_v1  ;;  %v197_v3 = vld [vmem:[%s1528_s1 + $0x90] sm:$0xff]  ;;  %v198_v4 = vld [vmem:[%s1528_s1 + $0x98] sm:$0xff]  ;;  %v199_v5 = vld [vmem:[%s1528_s1 + $0xa0] sm:$0xff]  ;;  %s945_s5 = sshll.u32 %s1533_s13, 4  ;;  %s946_s11 = smul.u32 192, %s1533_s13  ;;  %vm308_vm2 = vcmask 982016  }
   0xd   : > { %264 = vmatpush.msra.mxu2 %v202_v2  ;;  %v856_v6 = vld [vmem:[%s1528_s1 + $0x168] sm:$0xff]  ;;  %v194_v7 = vld [vmem:[%s1528_s1 + $0x78] sm:$0xff]  ;;  %v195_v8 = vld [vmem:[%s1528_s1 + $0x80] sm:$0xff]  ;;  %s1086_s20 = scalar_lea.vmem %s1527_s0, %s945_s5  ;;  %vm332_vm3 = vcmask 57344   ;;  %vm327_vm4 = vcmask 64512  }
   0xe   : > { %219 = vmatpush.msra.mxu0 %v197_v3  ;;  %242 = vmatpush.msra.mxu1 %v198_v4  ;;  %v196_v9 = vld [vmem:[%s1528_s1 + $0x88] sm:$0xff]  ;;  %v853_v10 = vld [vmem:[%s1528_s1 + $0x150] sm:$0xff]  ;;  %v191_v11 = vld [vmem:[%s1528_s1 + $0x60] sm:$0xff] }
   0xf   : > { %265 = vmatpush.msra.mxu2 %v199_v5  ;;  %367 = vmatpush.msra.mxu3 %v856_v6  ;;  %v192_v12 = vld [vmem:[%s1528_s1 + $0x68] sm:$0xff]  ;;  %v193_v13 = vld [vmem:[%s1528_s1 + $0x70] sm:$0xff]  ;;  %v850_v14 = vld [vmem:[%s1528_s1 + $0x138] sm:$0xff] }
  0x10   : > { %220 = vmatpush.msra.mxu0 %v194_v7  ;;  %243 = vmatpush.msra.mxu1 %v195_v8  ;;  %v188_v15 = vld [vmem:[%s1528_s1 + $0x48] sm:$0xff]  ;;  %v189_v16 = vld [vmem:[%s1528_s1 + $0x50] sm:$0xff]  ;;  %v190_v17 = vld [vmem:[%s1528_s1 + $0x58] sm:$0xff] }
  0x11   : > { %266 = vmatpush.msra.mxu2 %v196_v9  ;;  %368 = vmatpush.msra.mxu3 %v853_v10  ;;  %v847_v18 = vld [vmem:[%s1528_s1 + $0x120] sm:$0xff]  ;;  %v185_v19 = vld [vmem:[%s1528_s1 + $0x30] sm:$0xff]  ;;  %v186_v20 = vld [vmem:[%s1528_s1 + $0x38] sm:$0xff] }
  0x12   : > { %221 = vmatpush.msra.mxu0 %v191_v11  ;;  %244 = vmatpush.msra.mxu1 %v192_v12  ;;  %v187_v21 = vld [vmem:[%s1528_s1 + $0x40] sm:$0xff]  ;;  %v844_v22 = vld [vmem:[%s1528_s1 + $0x108] sm:$0xff]  ;;  %v182_v23 = vld [vmem:[%s1528_s1 + $0x18] sm:$0xff] }
  0x13   : > { %267 = vmatpush.msra.mxu2 %v193_v13  ;;  %369 = vmatpush.msra.mxu3 %v850_v14  ;;  %v183_v24 = vld [vmem:[%s1528_s1 + $0x20] sm:$0xff]  ;;  %v184_v25 = vld [vmem:[%s1528_s1 + $0x28] sm:$0xff]  ;;  %v841_v26 = vld [vmem:[%s1528_s1 + $0xf0] sm:$0xff] }
  0x14   : > { %222 = vmatpush.msra.mxu0 %v188_v15  ;;  %245 = vmatpush.msra.mxu1 %v189_v16  ;;  %v179_v27 = vld [vmem:[%s1528_s1] sm:$0xff]  ;;  %v180_v28 = vld [vmem:[%s1528_s1 + $0x8] sm:$0xff]  ;;  %v181_v29 = vld [vmem:[%s1528_s1 + $0x10] sm:$0xff] }
  0x15   : > { %268 = vmatpush.msra.mxu2 %v190_v17  ;;  %370 = vmatpush.msra.mxu3 %v847_v18  ;;  %v838_v30 = vld [vmem:[%s1528_s1 + $0xd8] sm:$0xff]  ;;  %v1101_v31 = vld [vmem:[%s1086_s20] sm:$0xff]  ;;  %v857_v33 = vld [vmem:[%s1528_s1 + $0x170] sm:$0xff] }
  0x16   : > { %223 = vmatpush.msra.mxu0 %v185_v19  ;;  %246 = vmatpush.msra.mxu1 %v186_v20  ;;  %v835_v32 = vld [vmem:[%s1528_s1 + $0xc0] sm:$0xff]  ;;  %v858_v34 = vld [vmem:[%s1528_s1 + $0x178] sm:$0xff]  ;;  %v892_v35 = vld [vmem:[%s1528_s1 + $0x228] sm:$0xff] }
  0x17   : > { %269 = vmatpush.msra.mxu2 %v187_v21  ;;  %371 = vmatpush.msra.mxu3 %v844_v22  ;;  %v854_v36 = vld [vmem:[%s1528_s1 + $0x158] sm:$0xff]  ;;  %v855_v37 = vld [vmem:[%s1528_s1 + $0x160] sm:$0xff]  ;;  %v893_v38 = vld [vmem:[%s1528_s1 + $0x230] sm:$0xff] }
  0x18   : > { %224 = vmatpush.msra.mxu0 %v182_v23  ;;  %247 = vmatpush.msra.mxu1 %v183_v24  ;;  %v889_v39 = vld [vmem:[%s1528_s1 + $0x210] sm:$0xff]  ;;  %v851_v40 = vld [vmem:[%s1528_s1 + $0x140] sm:$0xff]  ;;  %v852_v41 = vld [vmem:[%s1528_s1 + $0x148] sm:$0xff] }
  0x19   : > { %270 = vmatpush.msra.mxu2 %v184_v25  ;;  %372 = vmatpush.msra.mxu3 %v841_v26  ;;  %v890_v42 = vld [vmem:[%s1528_s1 + $0x218] sm:$0xff]  ;;  %v848_v44 = vld [vmem:[%s1528_s1 + $0x128] sm:$0xff]  ;;  %v849_v45 = vld [vmem:[%s1528_s1 + $0x130] sm:$0xff] }
  0x1a   : > { %225 = vmatpush.msra.mxu0 %v179_v27  ;;  %248 = vmatpush.msra.mxu1 %v180_v28  ;;  %v886_v43 = vld [vmem:[%s1528_s1 + $0x1f8] sm:$0xff]  ;;  %v887_v46 = vld [vmem:[%s1528_s1 + $0x200] sm:$0xff]  ;;  %v1157_v47 = vld [vmem:[%s1086_s20 + $0x8] sm:$0xff]  ;;  %s1426_s20 = scalar_lea.vmem %s1530_s3, %s946_s11 }
  0x1b   : > { %271 = vmatpush.msra.mxu2 %v181_v29  ;;  %373 = vmatpush.msra.mxu3 %v838_v30  ;;  %v845_v48 = vld [vmem:[%s1528_s1 + $0x110] sm:$0xff]  ;;  %v846_v49 = vld [vmem:[%s1528_s1 + $0x118] sm:$0xff]  ;;  %v884_v50 = vld [vmem:[%s1528_s1 + $0x1e8] sm:$0xff] }
  0x1c   : > { %829 = vmatmul.msk.f32.vlgmr.msra.gmra.mxu0 %vm203_vm0, %v1101_v31  ;;  %831 = vmatmul.msk.f32.vlgmr.msra.gmra.mxu1 %vm203_vm0, %v1101_v31  ;;  %v883_v51 = vld [vmem:[%s1528_s1 + $0x1e0] sm:$0xff]  ;;  %v842_v52 = vld [vmem:[%s1528_s1 + $0xf8] sm:$0xff]  ;;  %v881_v54 = vld [vmem:[%s1528_s1 + $0x1d0] sm:$0xff] }
  0x1d   : > { %833 = vmatmul.msk.f32.vlgmr.msra.gmra.mxu2 %vm203_vm0, %v1101_v31  ;;  %374 = vmatpush.msra.mxu3 %v835_v32  ;;  %v843_v53 = vld [vmem:[%s1528_s1 + $0x100] sm:$0xff]  ;;  %v880_v56 = vld [vmem:[%s1528_s1 + $0x1c8] sm:$0xff]  ;;  %v878_v58 = vld [vmem:[%s1528_s1 + $0x1b8] sm:$0xff] }
  0x1e   : > { %390 = vmatpush.msrb.mxu0 %v857_v33  ;;  %413 = vmatpush.msrb.mxu1 %v858_v34  ;;  %v839_v55 = vld [vmem:[%s1528_s1 + $0xe0] sm:$0xff]  ;;  %v840_v57 = vld [vmem:[%s1528_s1 + $0xe8] sm:$0xff]  ;;  %v877_v60 = vld [vmem:[%s1528_s1 + $0x1b0] sm:$0xff] }
  0x1f   : > { %859 = vmatmul.msk.f32.vlgmr.msra.gmra.mxu3 %vm203_vm0, %v1101_v31  ;;  %511 = vmatpush.msrb.mxu2 %v892_v35  ;;  %v836_v59 = vld [vmem:[%s1528_s1 + $0xc8] sm:$0xff]  ;;  %v837_v61 = vld [vmem:[%s1528_s1 + $0xd0] sm:$0xff]  ;;  %v875_v62 = vld [vmem:[%s1528_s1 + $0x1a0] sm:$0xff] }
  0x20   : > { %391 = vmatpush.msrb.mxu0 %v854_v36  ;;  %414 = vmatpush.msrb.mxu1 %v855_v37  ;;  %v872_v63 = vld [vmem:[%s1528_s1 + $0x188] sm:$0xff]  ;;  %v874_v0 = vld [vmem:[%s1528_s1 + $0x198] sm:$0xff]  ;;  %v871_v3 = vld [vmem:[%s1528_s1 + $0x180] sm:$0xff] }
  0x21   : > { %534 = vmatpush.msrb.mxu3 %v893_v38  ;;  %512 = vmatpush.msrb.mxu2 %v889_v39  ;;  %v894_v1 = vld [vmem:[%s1528_s1 + $0x238] sm:$0xff]  ;;  %v891_v4 = vld [vmem:[%s1528_s1 + $0x220] sm:$0xff]  ;;  %v929_v6 = vld [vmem:[%s1528_s1 + $0x2f0] sm:$0xff] }
  0x22   : > { %392 = vmatpush.msrb.mxu0 %v851_v40  ;;  %415 = vmatpush.msrb.mxu1 %v852_v41  ;;  %v930_v2 = vld [vmem:[%s1528_s1 + $0x2f8] sm:$0xff]  ;;  %v927_v5 = vld [vmem:[%s1528_s1 + $0x2e0] sm:$0xff]  ;;  %v888_v7 = vld [vmem:[%s1528_s1 + $0x208] sm:$0xff] }
  0x23   : > { %535 = vmatpush.msrb.mxu3 %v890_v42  ;;  %513 = vmatpush.msrb.mxu2 %v886_v43  ;;  %v924_v8 = vld [vmem:[%s1528_s1 + $0x2c8] sm:$0xff]  ;;  %v926_v9 = vld [vmem:[%s1528_s1 + $0x2d8] sm:$0xff]  ;;  %v921_v10 = vld [vmem:[%s1528_s1 + $0x2b0] sm:$0xff] }
  0x24   : > { %393 = vmatpush.msrb.mxu0 %v848_v44  ;;  %416 = vmatpush.msrb.mxu1 %v849_v45  ;;  %v885_v11 = vld [vmem:[%s1528_s1 + $0x1f0] sm:$0xff]  ;;  %v923_v12 = vld [vmem:[%s1528_s1 + $0x2c0] sm:$0xff]  ;;  %v918_v13 = vld [vmem:[%s1528_s1 + $0x298] sm:$0xff] }
  0x25   : > { %536 = vmatpush.msrb.mxu3 %v887_v46  ;;  %830 = vmatmul.msk.f32.gmra.mxu0 %vm203_vm0, %v1157_v47  ;;  %v882_v14 = vld [vmem:[%s1528_s1 + $0x1d8] sm:$0xff]  ;;  %v920_v15 = vld [vmem:[%s1528_s1 + $0x2a8] sm:$0xff]  ;;  %v915_v16 = vld [vmem:[%s1528_s1 + $0x280] sm:$0xff] }
  0x26   : > { %832 = vmatmul.msk.f32.gmra.mxu1 %vm203_vm0, %v1157_v47  ;;  %834 = vmatmul.msk.f32.gmra.mxu2 %vm203_vm0, %v1157_v47  ;;  %v879_v17 = vld [vmem:[%s1528_s1 + $0x1c0] sm:$0xff]  ;;  %v917_v18 = vld [vmem:[%s1528_s1 + $0x290] sm:$0xff]  ;;  %v912_v19 = vld [vmem:[%s1528_s1 + $0x268] sm:$0xff] }
  0x27   : > { %394 = vmatpush.msrb.mxu0 %v845_v48  ;;  %417 = vmatpush.msrb.mxu1 %v846_v49  ;;  %v876_v20 = vld [vmem:[%s1528_s1 + $0x1a8] sm:$0xff]  ;;  %v914_v21 = vld [vmem:[%s1528_s1 + $0x278] sm:$0xff]  ;;  %v909_v22 = vld [vmem:[%s1528_s1 + $0x250] sm:$0xff] }
  0x28   : > { %537 = vmatpush.msrb.mxu3 %v884_v50  ;;  %514 = vmatpush.msrb.mxu2 %v883_v51  ;;  %v873_v23 = vld [vmem:[%s1528_s1 + $0x190] sm:$0xff]  ;;  %v911_v24 = vld [vmem:[%s1528_s1 + $0x260] sm:$0xff]  ;;  %v908_v25 = vld [vmem:[%s1528_s1 + $0x248] sm:$0xff] }
  0x29   : > { %860 = vmatmul.msk.f32.gmra.mxu3 %vm203_vm0, %v1157_v47  ;;  %395 = vmatpush.msrb.mxu0 %v842_v52  ;;  %v928_v26 = vld [vmem:[%s1528_s1 + $0x2e8] sm:$0xff]  ;;  %v925_v27 = vld [vmem:[%s1528_s1 + $0x2d0] sm:$0xff]  ;;  %v922_v28 = vld [vmem:[%s1528_s1 + $0x2b8] sm:$0xff] }
  0x2a   : > { %418 = vmatpush.msrb.mxu1 %v843_v53  ;;  %538 = vmatpush.msrb.mxu3 %v881_v54  ;;  %v919_v29 = vld [vmem:[%s1528_s1 + $0x2a0] sm:$0xff]  ;;  %v916_v34 = vld [vmem:[%s1528_s1 + $0x288] sm:$0xff]  ;;  %v913_v35 = vld [vmem:[%s1528_s1 + $0x270] sm:$0xff] }
  0x2b   : > { %396 = vmatpush.msrb.mxu0 %v839_v55  ;;  %515 = vmatpush.msrb.mxu2 %v880_v56  ;;  %v910_v37 = vld [vmem:[%s1528_s1 + $0x258] sm:$0xff]  ;;  %v907_v38 = vld [vmem:[%s1528_s1 + $0x240] sm:$0xff] }
  0x2c   : > { %419 = vmatpush.msrb.mxu1 %v840_v57  ;;  %539 = vmatpush.msrb.mxu3 %v878_v58 }
  0x2d   : > { %397 = vmatpush.msrb.mxu0 %v836_v59  ;;  %516 = vmatpush.msrb.mxu2 %v877_v60 }
  0x2e   : > { %420 = vmatpush.msrb.mxu1 %v837_v61  ;;  %540 = vmatpush.msrb.mxu3 %v875_v62 }
  0x2f   : > { %861 = vmatmul.msk.f32.vlgmr.msrb.gmra.mxu0 %vm203_vm0, %v1101_v31  ;;  %863 = vmatmul.msk.f32.vlgmr.msrb.gmra.mxu1 %vm203_vm0, %v1101_v31 }
  0x30   : > { %541 = vmatpush.msrb.mxu3 %v872_v63  ;;  %517 = vmatpush.msrb.mxu2 %v874_v0 }
  0x31   : > { %897 = vmatmul.msk.f32.vlgmr.msrb.gmra.mxu3 %vm203_vm0, %v1101_v31  ;;  %557 = vmatpush.msra.mxu0 %v894_v1 }
  0x32   : > { %701 = vmatpush.msra.mxu3 %v930_v2  ;;  %518 = vmatpush.msrb.mxu2 %v871_v3 }
  0x33   : > { %895 = vmatmul.msk.f32.vlgmr.msrb.gmra.mxu2 %vm203_vm0, %v1101_v31  ;;  %558 = vmatpush.msra.mxu0 %v891_v4 }
  0x34   : > { %702 = vmatpush.msra.mxu3 %v927_v5  ;;  %678 = vmatpush.msra.mxu2 %v929_v6 }
  0x35   : > { %559 = vmatpush.msra.mxu0 %v888_v7  ;;  %655 = vmatpush.msra.mxu1 %v928_v26 }
  0x36   : > { %703 = vmatpush.msra.mxu3 %v924_v8  ;;  %679 = vmatpush.msra.mxu2 %v926_v9 }
  0x37   : > { %862 = vmatmul.msk.f32.gmra.mxu0 %vm203_vm0, %v1157_v47  ;;  %864 = vmatmul.msk.f32.gmra.mxu1 %vm203_vm0, %v1157_v47 }
  0x38   : > { %704 = vmatpush.msra.mxu3 %v921_v10  ;;  %560 = vmatpush.msra.mxu0 %v885_v11 }
  0x39   : > { %898 = vmatmul.msk.f32.gmra.mxu3 %vm203_vm0, %v1157_v47  ;;  %680 = vmatpush.msra.mxu2 %v923_v12 }
  0x3a   : > { %705 = vmatpush.msra.mxu3 %v918_v13  ;;  %561 = vmatpush.msra.mxu0 %v882_v14 }
  0x3b   : > { %681 = vmatpush.msra.mxu2 %v920_v15  ;;  %656 = vmatpush.msra.mxu1 %v925_v27 }
  0x3c   : > { %706 = vmatpush.msra.mxu3 %v915_v16  ;;  %896 = vmatmul.msk.f32.gmra.mxu2 %vm203_vm0, %v1157_v47 }
  0x3d   : > { %562 = vmatpush.msra.mxu0 %v879_v17  ;;  %682 = vmatpush.msra.mxu2 %v917_v18  ;;  %v173_v17 = vld [vmem:[%s1529_s2] sm:$0x3] }
  0x3e   : > { %707 = vmatpush.msra.mxu3 %v912_v19  ;;  %657 = vmatpush.msra.mxu1 %v922_v28  ;;  %v1421_v18 = vperm.slane %v173_v17, 1  ;;  %v1428_v19 = vperm.slane %v173_v17, 0 }
  0x3f   : > { %563 = vmatpush.msra.mxu0 %v876_v20  ;;  %683 = vmatpush.msra.mxu2 %v914_v21 }
  0x40   : > { %708 = vmatpush.msra.mxu3 %v909_v22  ;;  %658 = vmatpush.msra.mxu1 %v919_v29 }
  0x41   : > { %935 = vmatmul.msk.f32.vlgmr.msra.gmra.mxu3 %vm203_vm0, %v1101_v31  ;;  %564 = vmatpush.msra.mxu0 %v873_v23 }
  0x42   : > { %684 = vmatpush.msra.mxu2 %v911_v24  ;;  %899 = vmatmul.msk.f32.vlgmr.msra.gmra.mxu0 %vm203_vm0, %v1101_v31 }
  0x43   : > { %659 = vmatpush.msra.mxu1 %v916_v34 }
  0x44   : > { %685 = vmatpush.msra.mxu2 %v908_v25 }
  0x45   : > { %933 = vmatmul.msk.f32.vlgmr.msra.gmra.mxu2 %vm203_vm0, %v1101_v31  ;;  %660 = vmatpush.msra.mxu1 %v913_v35 }
  0x47   : > { %661 = vmatpush.msra.mxu1 %v910_v37 }
  0x49   : > { %936 = vmatmul.msk.f32.gmra.mxu3 %vm203_vm0, %v1157_v47  ;;  %662 = vmatpush.msra.mxu1 %v907_v38 }
  0x4a   : > { %900 = vmatmul.msk.f32.gmra.mxu0 %vm203_vm0, %v1157_v47  ;;  %931 = vmatmul.msk.f32.vlgmr.msra.gmra.mxu1 %vm203_vm0, %v1101_v31 }
  0x4d   : > { %934 = vmatmul.msk.f32.gmra.mxu2 %vm203_vm0, %v1157_v47 }
  0x52   : > { %932 = vmatmul.msk.f32.gmra.mxu1 %vm203_vm0, %v1157_v47 }
  0x99   : > { %v1333_v30 = vpop.f32.mrf.mxu0  ;;  %v1335_v32 = vpop.f32.mrf.mxu1 }
  0x9a   : > { %v290_v33 = vrot.slane %v1335_v32, 7  ;;  %v280_v26 = vadd.f32 %v1335_v32, %v1421_v18  ;;  %v279_v28 = vadd.f32 %v1333_v30, %v1428_v19 }
  0x9c   : > { %296 = vrot.lane.b32.xlu0 %v290_v33, %s964_s29 }
  0xa0   : > { %v273_v36 = vpop.f32.mrf.mxu2 }
  0xa1   : > { %v291_v39 = vrot.slane %v273_v36, 7 }
  0xa2   : > { %v1351_v40 = vpop.f32.mrf.mxu0  ;;  %v1353_v41 = vpop.f32.mrf.mxu3 }
  0xa3   : > { %v1355_v42 = vpop.f32.mrf.mxu1 }
  0xa4   : > { %298 = vrot.lane.b32.xlu0 %v291_v39, %s964_s29  ;;  %v292_v43 = vrot.slane %v1355_v42, 7  ;;  %v282_v30 = vadd.f32 %v1355_v42, %v1421_v18 }
  0xa6   : > { %304 = vrot.lane.b32.xlu2 %v292_v43, %s964_s29  ;;  %v293_v44 = vsel %vm289_vm1, %v290_v33, %v292_v43 }
  0xa7   : > { %300 = vrot.lane.b32.xlu1 %v293_v44, %s964_s29  ;;  %v281_v44 = vadd.f32 %v1351_v40, %v1428_v19  ;;  %v428_v40 = vadd.f32 %v1353_v41, %v1428_v19 }
  0xa9   : > { %v276_v45 = vpop.f32.mrf.mxu2 }
  0xaa   : > { %v294_v46 = vrot.slane %v276_v45, 7 }
  0xac   : > { %v1364_v48 = vpop.f32.mrf.mxu3  ;;  %v1366_v49 = vpop.f32.mrf.mxu0  ;;  %v295_v31 = vsel %vm289_vm1, %v291_v39, %v294_v46 }
  0xad   : > { %v436_v50 = vrot.slane %v1366_v49, 7  ;;  %v422_v51 = vpop.f32.mrf.mxu1 }
  0xae   : > { %306 = vrot.lane.b32.xlu2 %v294_v46, %s964_s29  ;;  %v437_v52 = vrot.slane %v422_v51, 7 }
  0xaf   : > { %442 = vrot.lane.b32.xlu0 %v436_v50, %s964_s29  ;;  %302 = vrot.lane.b32.xlu1 %v295_v31, %s964_s29 }
  0xb4   : > { %v1375_v53 = vpop.f32.mrf.mxu0  ;;  %v1377_v54 = vpop.f32.mrf.mxu3 }
  0xb5   : > { %v438_v55 = vrot.slane %v1375_v53, 7  ;;  %v425_v56 = vpop.f32.mrf.mxu1  ;;  %v580_v58 = vrot.slane %v1377_v54, 7  ;;  %v573_v32 = vadd.f32 %v1377_v54, %v1421_v18 }
  0xb6   : > { %v440_v47 = vrot.slane %v425_v56, 7  ;;  %v1380_v57 = vpop.f32.mrf.mxu2 }
  0xb7   : > { %450 = vrot.lane.b32.xlu2 %v438_v55, %s964_s29  ;;  %444 = vrot.lane.b32.xlu1 %v437_v52, %s964_s29  ;;  %v439_v60 = vsel %vm289_vm1, %v436_v50, %v438_v55  ;;  %v429_v55 = vadd.f32 %v1366_v49, %v1421_v18 }
  0xb8   : > { %452 = vrot.lane.b32.xlu0 %v440_v47, %s964_s29  ;;  %v441_v61 = vsel %vm289_vm1, %v437_v52, %v440_v47 }
  0xbc   : > { %v1386_v59 = vpop.f32.mrf.mxu3 }
  0xbd   : > { %v582_v0 = vrot.slane %v1386_v59, 7  ;;  %v575_v42 = vadd.f32 %v1386_v59, %v1421_v18 }
  0xbf   : > { %446 = vrot.lane.b32.xlu2 %v439_v60, %s964_s29  ;;  %586 = vrot.lane.b32.xlu1 %v580_v58, %s964_s29  ;;  %v1392_v62 = vpop.f32.mrf.mxu2  ;;  %v566_v63 = vpop.f32.mrf.mxu0  ;;  %v583_v3 = vsel %vm289_vm1, %v580_v58, %v582_v0 }
  0xc0   : > { %448 = vrot.lane.b32.xlu0 %v441_v61, %s964_s29  ;;  %v581_v1 = vrot.slane %v566_v63, 7 }
  0xc4   : > { %v710_v2 = vpop.f32.mrf.mxu3 }
  0xc5   : > { %v725_v7 = vrot.slane %v710_v2, 7  ;;  %v431_v2 = vadd.f32 %v1375_v53, %v1421_v18 }
  0xc7   : > { %588 = vrot.lane.b32.xlu2 %v581_v1, %s964_s29  ;;  %590 = vrot.lane.b32.xlu1 %v583_v3, %s964_s29  ;;  %v569_v4 = vpop.f32.mrf.mxu0 }
  0xc8   : > { %594 = vrot.lane.b32.xlu0 %v582_v0, %s964_s29  ;;  %v584_v5 = vrot.slane %v569_v4, 7  ;;  %v1400_v6 = vpop.f32.mrf.mxu2  ;;  %v430_v4 = vadd.f32 %v1364_v48, %v1428_v19 }
  0xc9   : > { %v724_v8 = vrot.slane %v1400_v6, 7 }
  0xca   : > { %v585_v9 = vsel %vm289_vm1, %v581_v1, %v584_v5 }
  0xcc   : > { %v713_v10 = vpop.f32.mrf.mxu3 }
  0xcd   : > { %v728_v13 = vrot.slane %v713_v10, 7 }
  0xcf   : > { %592 = vrot.lane.b32.xlu2 %v585_v9, %s964_s29  ;;  %732 = vrot.lane.b32.xlu1 %v725_v7, %s964_s29  ;;  %v729_v15 = vsel %vm289_vm1, %v725_v7, %v728_v13 }
  0xd0   : > { %730 = vrot.lane.b32.xlu0 %v724_v8, %s964_s29  ;;  %v1407_v11 = vpop.f32.mrf.mxu2 }
  0xd1   : > { %v726_v12 = vrot.slane %v1407_v11, 7 }
  0xd3   : > { %v727_v14 = vsel %vm289_vm1, %v724_v8, %v726_v12  ;;  %v572_v8 = vadd.f32 %v1380_v57, %v1428_v19 }
  0xd7   : > { %734 = vrot.lane.b32.xlu2 %v727_v14, %s964_s29  ;;  %596 = vrot.lane.b32.xlu1 %v584_v5, %s964_s29 }
  0xd8   : > { %736 = vrot.lane.b32.xlu0 %v729_v15, %s964_s29  ;;  %v574_v15 = vadd.f32 %v1392_v62, %v1428_v19 }
  0xdf   : > { %740 = vrot.lane.b32.xlu2 %v728_v13, %s964_s29  ;;  %738 = vrot.lane.b32.xlu1 %v726_v12, %s964_s29 }
 0x100   : > { %v305_v16 = vpop.permute.xlu2 %304 }
 0x108   : > { %v307_v20 = vpop.permute.xlu2 %306 }
 0x109   : > { %v311_v21 = vsel %vm308_vm2, %v305_v16, %v307_v20  ;;  %v325_v22 = vadd.f32 %v307_v20, %v1421_v18 }
 0x10a   : > { %v324_v23 = vadd.f32 %v311_v21, %v1428_v19  ;;  %v664_v21 = vpop.f32.mrf.mxu1 }
 0x10b   : > { %333 = vst.msk [vmem:[%s1426_s20 + $0x28] sm:$0x1] %vm332_vm3, %v325_v22 }
 0x10c   : > { %331 = vst [vmem:[%s1426_s20 + $0x20] sm:$0x1] %v324_v23  ;;  %v716_v23 = vadd.f32 %v664_v21, %v1428_v19 }
 0x10e   : > { %v297_v24 = vpop.permute.xlu0 %296 }
 0x111   : > { %v451_v25 = vpop.permute.xlu2 %450 }
 0x116   : > { %v299_v27 = vpop.permute.xlu0 %298 }
 0x117   : > { %v309_v29 = vsel %vm308_vm2, %v297_v24, %v299_v27  ;;  %v319_v33 = vsel %vm289_vm1, 0.0, %v299_v27  ;;  %v717_v24 = vadd.f32 %v1400_v6, %v1421_v18 }
 0x118   : > { %v318_v34 = vsel %vm289_vm1, 0.0, %v309_v29  ;;  %v321_v35 = vadd.f32 %v319_v33, %v280_v26 }
 0x119   : > { %v320_v36 = vadd.f32 %v318_v34, %v279_v28  ;;  %v447_v37 = vpop.permute.xlu2 %446  ;;  %v301_v38 = vpop.permute.xlu1 %300 }
 0x11a   : > { %328 = vst.msk [vmem:[%s1426_s20 + $0x8] sm:$0xff] %vm327_vm4, %v321_v35  ;;  %v667_v34 = vpop.f32.mrf.mxu1  ;;  %v719_v35 = vadd.f32 %v1407_v11, %v1421_v18 }
 0x11b   : > { %326 = vst [vmem:[%s1426_s20] sm:$0xff] %v320_v36  ;;  %v718_v6 = vadd.f32 %v667_v34, %v1428_v19 }
 0x121   : > { %v443_v39 = vpop.permute.xlu0 %442  ;;  %v589_v43 = vpop.permute.xlu2 %588 }
 0x122   : > { %v608_v45 = vsel %vm289_vm1, 0.0, %v589_v43  ;;  %v303_v46 = vpop.permute.xlu1 %302 }
 0x123   : > { %v610_v50 = vadd.f32 %v608_v45, %v573_v32  ;;  %v310_v51 = vsel %vm308_vm2, %v301_v38, %v303_v46  ;;  %v323_v31 = vadd.f32 %v303_v46, %v282_v30 }
 0x124   : > { %v322_v52 = vadd.f32 %v310_v51, %v281_v44 }
 0x125   : > { %902 = vst.msk [vmem:[%s1426_s20 + $0x68] sm:$0xff] %vm327_vm4, %v610_v50 }
 0x126   : > { %329 = vst [vmem:[%s1426_s20 + $0x10] sm:$0xff] %v322_v52 }
 0x127   : > { %330 = vst.msk [vmem:[%s1426_s20 + $0x18] sm:$0xff] %vm327_vm4, %v323_v31 }
 0x129   : > { %v593_v54 = vpop.permute.xlu2 %592 }
 0x12a   : > { %v453_v56 = vpop.permute.xlu0 %452  ;;  %v612_v47 = vadd.f32 %v593_v54, %v575_v42  ;;  %v445_v58 = vpop.permute.xlu1 %444 }
 0x12b   : > { %v456_v60 = vsel %vm308_vm2, %v451_v25, %v453_v56  ;;  %v470_v61 = vadd.f32 %v453_v56, %v1421_v18  ;;  %v454_v63 = vsel %vm308_vm2, %v443_v39, %v445_v58  ;;  %v464_v59 = vsel %vm289_vm1, 0.0, %v445_v58 }
 0x12c   : > { %v469_v0 = vadd.f32 %v456_v60, %v1428_v19  ;;  %904 = vst.msk [vmem:[%s1426_s20 + $0x78] sm:$0xff] %vm327_vm4, %v612_v47  ;;  %v463_v41 = vsel %vm289_vm1, 0.0, %v454_v63  ;;  %v466_v1 = vadd.f32 %v464_v59, %v429_v55 }
 0x12d   : > { %870 = vst.msk [vmem:[%s1426_s20 + $0x58] sm:$0x1] %vm332_vm3, %v470_v61  ;;  %v465_v49 = vadd.f32 %v463_v41, %v428_v40 }
 0x12e   : > { %869 = vst [vmem:[%s1426_s20 + $0x50] sm:$0x1] %v469_v0 }
 0x12f   : > { %865 = vst [vmem:[%s1426_s20 + $0x30] sm:$0xff] %v465_v49 }
 0x130   : > { %866 = vst.msk [vmem:[%s1426_s20 + $0x38] sm:$0xff] %vm327_vm4, %v466_v1 }
 0x131   : > { %v735_v3 = vpop.permute.xlu2 %734 }
 0x132   : > { %v449_v5 = vpop.permute.xlu0 %448  ;;  %v587_v7 = vpop.permute.xlu1 %586 }
 0x133   : > { %v455_v9 = vsel %vm308_vm2, %v447_v37, %v449_v5  ;;  %v468_v10 = vadd.f32 %v449_v5, %v431_v2  ;;  %v598_v12 = vsel %vm308_vm2, %v587_v7, %v589_v43 }
 0x134   : > { %v467_v13 = vadd.f32 %v455_v9, %v430_v4  ;;  %v607_v14 = vsel %vm289_vm1, 0.0, %v598_v12 }
 0x135   : > { %868 = vst.msk [vmem:[%s1426_s20 + $0x48] sm:$0xff] %vm327_vm4, %v468_v10  ;;  %v609_v53 = vadd.f32 %v607_v14, %v572_v8 }
 0x136   : > { %867 = vst [vmem:[%s1426_s20 + $0x40] sm:$0xff] %v467_v13 }
 0x137   : > { %901 = vst [vmem:[%s1426_s20 + $0x60] sm:$0xff] %v609_v53 }
 0x139   : > { %v741_v48 = vpop.permute.xlu2 %740 }
 0x13a   : > { %v595_v57 = vpop.permute.xlu0 %594  ;;  %v758_v16 = vadd.f32 %v741_v48, %v1421_v18  ;;  %v591_v17 = vpop.permute.xlu1 %590 }
 0x13b   : > { %v599_v20 = vsel %vm308_vm2, %v591_v17, %v593_v54 }
 0x13c   : > { %942 = vst.msk [vmem:[%s1426_s20 + $0xb8] sm:$0x1] %vm332_vm3, %v758_v16  ;;  %v611_v22 = vadd.f32 %v599_v20, %v574_v15 }
 0x13e   : > { %903 = vst [vmem:[%s1426_s20 + $0x70] sm:$0xff] %v611_v22 }
 0x142   : > { %v731_v25 = vpop.permute.xlu0 %730  ;;  %v733_v62 = vpop.permute.xlu1 %732 }
 0x143   : > { %v742_v26 = vsel %vm308_vm2, %v731_v25, %v733_v62  ;;  %v752_v27 = vsel %vm289_vm1, 0.0, %v733_v62 }
 0x144   : > { %v751_v28 = vsel %vm289_vm1, 0.0, %v742_v26  ;;  %v754_v29 = vadd.f32 %v752_v27, %v717_v24 }
 0x145   : > { %v753_v33 = vadd.f32 %v751_v28, %v716_v23 }
 0x146   : > { %938 = vst.msk [vmem:[%s1426_s20 + $0x98] sm:$0xff] %vm327_vm4, %v754_v29 }
 0x147   : > { %937 = vst [vmem:[%s1426_s20 + $0x90] sm:$0xff] %v753_v33 }
 0x14a   : > { %v737_v36 = vpop.permute.xlu0 %736  ;;  %v597_v37 = vpop.permute.xlu1 %596 }
 0x14b   : > { %v743_v38 = vsel %vm308_vm2, %v735_v3, %v737_v36  ;;  %v756_v30 = vadd.f32 %v737_v36, %v719_v35  ;;  %v600_v32 = vsel %vm308_vm2, %v595_v57, %v597_v37  ;;  %v614_v44 = vadd.f32 %v597_v37, %v1421_v18 }
 0x14c   : > { %v755_v39 = vadd.f32 %v743_v38, %v718_v6  ;;  %v613_v43 = vadd.f32 %v600_v32, %v1428_v19 }
 0x14d   : > { %940 = vst.msk [vmem:[%s1426_s20 + $0xa8] sm:$0xff] %vm327_vm4, %v756_v30 }
 0x14e   : > { %939 = vst [vmem:[%s1426_s20 + $0xa0] sm:$0xff] %v755_v39 }
 0x14f   : > { %905 = vst [vmem:[%s1426_s20 + $0x80] sm:$0x1] %v613_v43 }
 0x150   : > { %906 = vst.msk [vmem:[%s1426_s20 + $0x88] sm:$0x1] %vm332_vm3, %v614_v44 }
 0x152   : > { %v739_v11 = vpop.permute.xlu1 %738 }
 0x153   : > { %v744_v45 = vsel %vm308_vm2, %v739_v11, %v741_v48 }
 0x154   : > { %v757_v46 = vadd.f32 %v744_v45, %v1428_v19 }
 0x156   : > { %941 = vst [vmem:[%s1426_s20 + $0xb0] sm:$0x1] %v757_v46 }
 0x157 PF: > { %s13_s12 = sadd.s32 1, %s962_s12  }
 0x158   : > { %p10_p4 = scmp.ge.s32.totalorder %s13_s12, 4  }
 0x15a   :  { %12 = sbr.rel (!%p10_p4) target bundleno = 1 (0x1), region = 68 }

</bundles_post_ra>
